<compile_context>
chip_gen: v6e
topology: v6e:2x2x1
jax: 0.10.0
libtpu: 0.0.40
codegen_flags: <defaults>
</compile_context>

<pallas_src>
import functools

import jax
import jax.numpy as jnp
from jax.experimental import pallas as pl
from jax.experimental.pallas import tpu as pltpu

EPS = 1e-5  # nn.BatchNorm1d default


def _bn_stats_kernel(x_ref, gamma_ref, beta_ref, a_ref, b_ref, *,
                     inv_count, n_total, tile_n, need_mask):
    """Accumulate per-channel sum / sum-of-squares; fold into (a, b) at the end.

    x_ref:     (tile_n, CV, T) block of the input (grid steps over N).
    gamma_ref: (CV, 1) full block, constant index -> DMA'd once.
    beta_ref:  (CV, 1) full block, constant index -> DMA'd once.
    a_ref:     (CV, 1) resident output; holds sum(x)   until the last step,
               then gamma * rsqrt(var + eps).
    b_ref:     (CV, 1) resident output; holds sum(x^2) until the last step,
               then beta - mean * a.
    """
    step = pl.program_id(0)

    @pl.when(step == 0)
    def _():
        a_ref[...] = jnp.zeros_like(a_ref)
        b_ref[...] = jnp.zeros_like(b_ref)

    x = x_ref[...].astype(jnp.float32)
    if need_mask:
        # Last block may be partial along N; zero the padded (undefined) rows
        # so they do not pollute the reduction.
        valid = n_total - step * tile_n
        rows = jax.lax.broadcasted_iota(jnp.int32, x.shape, 0)
        x = jnp.where(rows < valid, x, 0.0)

    # Reduce lanes (T) first, then the leading batch-tile dim -> (CV, 1).
    a_ref[...] += jnp.sum(jnp.sum(x, axis=2, keepdims=True), axis=0)
    b_ref[...] += jnp.sum(jnp.sum(x * x, axis=2, keepdims=True), axis=0)

    @pl.when(step == pl.num_programs(0) - 1)
    def _():
        s1 = a_ref[...]
        s2 = b_ref[...]
        mean = s1 * inv_count
        # Single-pass biased variance; clamp fp cancellation noise.
        # TODO(synk): switch to per-block centered (Chan) combination if
        # |mean| >> std inputs ever show up; it costs no extra HBM traffic.
        var = jnp.maximum(s2 * inv_count - mean * mean, 0.0)
        a = gamma_ref[...].astype(jnp.float32) * jax.lax.rsqrt(var + EPS)
        a_ref[...] = a
        b_ref[...] = beta_ref[...].astype(jnp.float32) - mean * a


def _bn_apply_kernel(x_ref, a_ref, b_ref, o_ref):
    """y = x * a + b with per-channel (CV, 1) a, b broadcast over (tile_n, CV, T)."""
    x = x_ref[...].astype(jnp.float32)
    o_ref[...] = (x * a_ref[...] + b_ref[...]).astype(o_ref.dtype)


def _choose_tile_n(n, cv, t, itemsize, *, target_block_bytes=512 * 1024,
                   min_steps=4):
    """Batch tile: grid gets >= min_steps steps when N allows (pipelining; >=2
    feeds v7x megacore) while each (tile_n, CV, T) block stays under budget."""
    # TODO(synk): if a single sample (CV*T*itemsize) ever exceeds the VMEM
    # budget (huge T), tile T as well; the two-phase stats already supports it.
    bytes_per_sample = max(1, cv * t * itemsize)
    tn_budget = max(1, target_block_bytes // bytes_per_sample)
    tn_steps = max(1, n // min_steps)
    return int(max(1, min(tn_budget, tn_steps, n)))


def norm_data_forward(x, gamma, beta, *, tile_n=None):
    """x: (N, C, V, T); gamma/beta: (C*V,). Returns (N, C, V, T).

    nn.BatchNorm1d(C*V) in training mode (batch statistics over N and T).
    """
    N, C, V, T = x.shape
    CV = C * V
    itemsize = jnp.dtype(x.dtype).itemsize

    # Natural layout: (N, C, V, T) -> (N, CV, T) is a free view, no transpose.
    x3 = x.reshape(N, CV, T)
    g2 = gamma.reshape(CV, 1).astype(jnp.float32)
    b2 = beta.reshape(CV, 1).astype(jnp.float32)

    if tile_n is None:
        tile_n = _choose_tile_n(N, CV, T, itemsize)
    tile_n = int(max(1, min(tile_n, N)))
    grid = (pl.cdiv(N, tile_n),)
    need_mask = (N % tile_n) != 0

    block_bytes = tile_n * CV * T * itemsize
    # 2x double-buffered input + 2x double-buffered output + headroom; stays
    # within the 32 MiB scoped default that is safe on v5e/v6e/v7x.
    vmem_limit = int(min(48 * 1024 * 1024,
                         max(16 * 1024 * 1024, 8 * block_bytes)))

    x_spec = pl.BlockSpec((tile_n, CV, T), lambda i: (i, 0, 0))
    chan_spec = pl.BlockSpec((CV, 1), lambda i: (0, 0))  # constant -> single DMA

    stats_kernel = functools.partial(
        _bn_stats_kernel,
        inv_count=float(1.0 / (N * T)),
        n_total=N, tile_n=tile_n, need_mask=need_mask)

    a_cv, b_cv = pl.pallas_call(
        stats_kernel,
        out_shape=(jax.ShapeDtypeStruct((CV, 1), jnp.float32),
                   jax.ShapeDtypeStruct((CV, 1), jnp.float32)),
        grid=grid,
        in_specs=[x_spec, chan_spec, chan_spec],
        out_specs=(chan_spec, chan_spec),
        compiler_params=pltpu.CompilerParams(
            dimension_semantics=("arbitrary",),  # reduction over N -> resident out
            vmem_limit_bytes=vmem_limit),
        cost_estimate=pl.CostEstimate(
            flops=3 * N * CV * T,
            transcendentals=CV,
            bytes_accessed=N * CV * T * itemsize + 4 * CV * 4),
    )(x3, g2, b2)

    out3 = pl.pallas_call(
        _bn_apply_kernel,
        out_shape=jax.ShapeDtypeStruct((N, CV, T), x.dtype),
        grid=grid,
        in_specs=[x_spec, chan_spec, chan_spec],
        out_specs=x_spec,
        compiler_params=pltpu.CompilerParams(
            dimension_semantics=("parallel",),  # independent N tiles (v7x megacore)
            vmem_limit_bytes=vmem_limit),
        cost_estimate=pl.CostEstimate(
            flops=2 * N * CV * T,
            transcendentals=0,
            bytes_accessed=2 * N * CV * T * itemsize + 2 * CV * 4),
    )(x3, a_cv, b_cv)

    # Free view back to (N, C, V, T); no transpose.
    return out3.reshape(N, C, V, T)


def norm_data_reference(x, gamma, beta):
    """Pure-JAX reference (training-mode BatchNorm1d over C*V channels)."""
    N, C, V, T = x.shape
    CV = C * V
    x3 = x.reshape(N, CV, T).astype(jnp.float32)
    mean = jnp.mean(x3, axis=(0, 2), keepdims=True)
    var = jnp.mean((x3 - mean) ** 2, axis=(0, 2), keepdims=True)
    y = (x3 - mean) / jnp.sqrt(var + EPS)
    y = y * gamma.reshape(1, CV, 1) + beta.reshape(1, CV, 1)
    return y.reshape(N, C, V, T).astype(x.dtype)


if __name__ == "__main__":
    # Module-implied shapes: C=3 coords, V=25 joints; small batch, T=128 frames
    # (a multiple of 128 keeps the lane axis full-width / stores unmasked).
    N, C, V, T = 4, 3, 25, 128
    CV = C * V

    key = jax.random.PRNGKey(0)
    x = jax.random.normal(key, (N, C, V, T), dtype=jnp.float32)

    # Non-trivial affine params (nn.BatchNorm1d default is weight=1, bias=0).
    gamma = 1.0 + 0.01 * jnp.arange(CV, dtype=jnp.float32)
    beta = 0.001 * jnp.arange(CV, dtype=jnp.float32)

    ref = norm_data_reference(x, gamma, beta)

    # Auto tile: tile_n=1 -> grid=(4,), >=4 steps for pipelining / megacore.
    out = jax.block_until_ready(norm_data_forward(x, gamma, beta))
    assert out.shape == (N, C, V, T)
    assert jnp.allclose(out, ref, atol=1e-4, rtol=1e-4), "mismatch vs reference"

    # Partial-last-block path: tile_n=3 over N=4 -> grid=(2,), last block has
    # a single valid row (exercises the stats row mask + clipped writeback).
    out_p = jax.block_until_ready(norm_data_forward(x, gamma, beta, tile_n=3))
    assert jnp.allclose(out_p, ref, atol=1e-4, rtol=1e-4), "partial-tile mismatch"

    print("KERNEL_OK")
</pallas_src>

<mosaic_0001>
module attributes {stable_mosaic.version = 11 : i64} {
  func.func @_bn_stats_kernel(%arg0: i32, %arg1: memref<1x75x128xf32, #tpu.memory_space<vmem>>, %arg2: memref<75x1xf32, #tpu.memory_space<vmem>>, %arg3: memref<75x1xf32, #tpu.memory_space<vmem>>, %arg4: memref<75x1xf32, #tpu.memory_space<vmem>>, %arg5: memref<75x1xf32, #tpu.memory_space<vmem>>) attributes {dimension_semantics = [#tpu.dimension_semantics<arbitrary>], iteration_bounds = array<i64: 4>, scalar_prefetch = 0 : i64, scratch_operands = 0 : i64, tpu.core_type = #tpu.core_type<tc>, window_params = [{transform_indices = @transform_0, window_bounds = array<i64: 1, 75, 128>}, {pipeline_mode = #tpu.pipeline_mode<synchronous>, transform_indices = @transform_1, window_bounds = array<i64: 75, 1>}, {pipeline_mode = #tpu.pipeline_mode<synchronous>, transform_indices = @transform_2, window_bounds = array<i64: 75, 1>}, {pipeline_mode = #tpu.pipeline_mode<synchronous>, transform_indices = @transform_3, window_bounds = array<i64: 75, 1>}, {pipeline_mode = #tpu.pipeline_mode<synchronous>, transform_indices = @transform_4, window_bounds = array<i64: 75, 1>}]} {
    %c0_i32 = arith.constant 0 : i32
    %0 = arith.cmpi eq, %arg0, %c0_i32 : i32
    %1 = arith.extui %0 : i1 to i32
    %c0_i32_0 = arith.constant 0 : i32
    %2 = arith.cmpi ne, %1, %c0_i32_0 : i32
    scf.if %2 {
      %cst_15 = arith.constant 0.000000e+00 : f32
      %20 = vector.broadcast %cst_15 : f32 to vector<75x1xf32>
      %c0_16 = arith.constant 0 : index
      %c0_17 = arith.constant 0 : index
      %21 = vector.load %arg4[%c0_16, %c0_17] : memref<75x1xf32, #tpu.memory_space<vmem>>, vector<75x1xf32>
      tpu.vector_store %arg4[%c0_16, %c0_17], %20 {strides = array<i32>} : memref<75x1xf32, #tpu.memory_space<vmem>>, vector<75x1xf32>,
      %cst_18 = arith.constant 0.000000e+00 : f32
      %22 = vector.broadcast %cst_18 : f32 to vector<75x1xf32>
      %c0_19 = arith.constant 0 : index
      %c0_20 = arith.constant 0 : index
      %23 = vector.load %arg5[%c0_19, %c0_20] : memref<75x1xf32, #tpu.memory_space<vmem>>, vector<75x1xf32>
      tpu.vector_store %arg5[%c0_19, %c0_20], %22 {strides = array<i32>} : memref<75x1xf32, #tpu.memory_space<vmem>>, vector<75x1xf32>,
    } else {
    }
    %c0 = arith.constant 0 : index
    %c0_1 = arith.constant 0 : index
    %c0_2 = arith.constant 0 : index
    %3 = vector.load %arg1[%c0, %c0_1, %c0_2] : memref<1x75x128xf32, #tpu.memory_space<vmem>>, vector<1x75x128xf32>
    %c0_3 = arith.constant 0 : index
    %c0_4 = arith.constant 0 : index
    %4 = vector.load %arg4[%c0_3, %c0_4] : memref<75x1xf32, #tpu.memory_space<vmem>>, vector<75x1xf32>
    %cst = arith.constant dense<0.000000e+00> : vector<1x75xf32>
    %5 = vector.multi_reduction <add>, %3, %cst [2] : vector<1x75x128xf32> to vector<1x75xf32>
    %6 = vector.shape_cast %5 : vector<1x75xf32> to vector<1x75x1xf32>
    %cst_5 = arith.constant dense<0.000000e+00> : vector<75x1xf32>
    %7 = vector.multi_reduction <add>, %6, %cst_5 [0] : vector<1x75x1xf32> to vector<75x1xf32>
    %8 = arith.addf %4, %7 : vector<75x1xf32>
    %c0_6 = arith.constant 0 : index
    %c0_7 = arith.constant 0 : index
    %9 = vector.load %arg4[%c0_6, %c0_7] : memref<75x1xf32, #tpu.memory_space<vmem>>, vector<75x1xf32>
    tpu.vector_store %arg4[%c0_6, %c0_7], %8 {strides = array<i32>} : memref<75x1xf32, #tpu.memory_space<vmem>>, vector<75x1xf32>,
    %c0_8 = arith.constant 0 : index
    %c0_9 = arith.constant 0 : index
    %10 = vector.load %arg5[%c0_8, %c0_9] : memref<75x1xf32, #tpu.memory_space<vmem>>, vector<75x1xf32>
    %11 = arith.mulf %3, %3 : vector<1x75x128xf32>
    %cst_10 = arith.constant dense<0.000000e+00> : vector<1x75xf32>
    %12 = vector.multi_reduction <add>, %11, %cst_10 [2] : vector<1x75x128xf32> to vector<1x75xf32>
    %13 = vector.shape_cast %12 : vector<1x75xf32> to vector<1x75x1xf32>
    %cst_11 = arith.constant dense<0.000000e+00> : vector<75x1xf32>
    %14 = vector.multi_reduction <add>, %13, %cst_11 [0] : vector<1x75x1xf32> to vector<75x1xf32>
    %15 = arith.addf %10, %14 : vector<75x1xf32>
    %c0_12 = arith.constant 0 : index
    %c0_13 = arith.constant 0 : index
    %16 = vector.load %arg5[%c0_12, %c0_13] : memref<75x1xf32, #tpu.memory_space<vmem>>, vector<75x1xf32>
    tpu.vector_store %arg5[%c0_12, %c0_13], %15 {strides = array<i32>} : memref<75x1xf32, #tpu.memory_space<vmem>>, vector<75x1xf32>,
    %c3_i32 = arith.constant 3 : i32
    %17 = arith.cmpi eq, %arg0, %c3_i32 : i32
    %18 = arith.extui %17 : i1 to i32
    %c0_i32_14 = arith.constant 0 : i32
    %19 = arith.cmpi ne, %18, %c0_i32_14 : i32
    scf.if %19 {
      %c0_15 = arith.constant 0 : index
      %c0_16 = arith.constant 0 : index
      %20 = vector.load %arg4[%c0_15, %c0_16] : memref<75x1xf32, #tpu.memory_space<vmem>>, vector<75x1xf32>
      %c0_17 = arith.constant 0 : index
      %c0_18 = arith.constant 0 : index
      %21 = vector.load %arg5[%c0_17, %c0_18] : memref<75x1xf32, #tpu.memory_space<vmem>>, vector<75x1xf32>
      %cst_19 = arith.constant 0.001953125 : f32
      %22 = vector.broadcast %cst_19 : f32 to vector<75x1xf32>
      %23 = arith.mulf %20, %22 : vector<75x1xf32>
      %cst_20 = arith.constant 0.001953125 : f32
      %24 = vector.broadcast %cst_20 : f32 to vector<75x1xf32>
      %25 = arith.mulf %21, %24 : vector<75x1xf32>
      %26 = arith.mulf %23, %23 : vector<75x1xf32>
      %27 = arith.subf %25, %26 : vector<75x1xf32>
      %cst_21 = arith.constant 0.000000e+00 : f32
      %28 = vector.broadcast %cst_21 : f32 to vector<75x1xf32>
      %29 = arith.maximumf %27, %28 : vector<75x1xf32>
      %c0_22 = arith.constant 0 : index
      %c0_23 = arith.constant 0 : index
      %30 = vector.load %arg2[%c0_22, %c0_23] : memref<75x1xf32, #tpu.memory_space<vmem>>, vector<75x1xf32>
      %cst_24 = arith.constant 9.99999974E-6 : f32
      %31 = vector.broadcast %cst_24 : f32 to vector<75x1xf32>
      %32 = arith.addf %29, %31 : vector<75x1xf32>
      %33 = math.rsqrt %32 : vector<75x1xf32>
      %34 = arith.mulf %30, %33 : vector<75x1xf32>
      %c0_25 = arith.constant 0 : index
      %c0_26 = arith.constant 0 : index
      %35 = vector.load %arg4[%c0_25, %c0_26] : memref<75x1xf32, #tpu.memory_space<vmem>>, vector<75x1xf32>
      tpu.vector_store %arg4[%c0_25, %c0_26], %34 {strides = array<i32>} : memref<75x1xf32, #tpu.memory_space<vmem>>, vector<75x1xf32>,
      %c0_27 = arith.constant 0 : index
      %c0_28 = arith.constant 0 : index
      %36 = vector.load %arg3[%c0_27, %c0_28] : memref<75x1xf32, #tpu.memory_space<vmem>>, vector<75x1xf32>
      %37 = arith.mulf %23, %34 : vector<75x1xf32>
      %38 = arith.subf %36, %37 : vector<75x1xf32>
      %c0_29 = arith.constant 0 : index
      %c0_30 = arith.constant 0 : index
      %39 = vector.load %arg5[%c0_29, %c0_30] : memref<75x1xf32, #tpu.memory_space<vmem>>, vector<75x1xf32>
      tpu.vector_store %arg5[%c0_29, %c0_30], %38 {strides = array<i32>} : memref<75x1xf32, #tpu.memory_space<vmem>>, vector<75x1xf32>,
    } else {
    }
    return
  }
  func.func @transform_0(%arg0: i32) -> (i32, i32, i32) {
    %c0_i32 = arith.constant 0 : i32
    %c0_i32_0 = arith.constant 0 : i32
    %c0_i32_1 = arith.constant 0 : i32
    return %arg0, %c0_i32, %c0_i32_0 : i32, i32, i32
  }
  func.func @transform_1(%arg0: i32) -> (i32, i32) {
    %c0_i32 = arith.constant 0 : i32
    %c0_i32_0 = arith.constant 0 : i32
    %c0_i32_1 = arith.constant 0 : i32
    return %c0_i32, %c0_i32_0 : i32, i32
  }
  func.func @transform_2(%arg0: i32) -> (i32, i32) {
    %c0_i32 = arith.constant 0 : i32
    %c0_i32_0 = arith.constant 0 : i32
    %c0_i32_1 = arith.constant 0 : i32
    return %c0_i32, %c0_i32_0 : i32, i32
  }
  func.func @transform_3(%arg0: i32) -> (i32, i32) {
    %c0_i32 = arith.constant 0 : i32
    %c0_i32_0 = arith.constant 0 : i32
    %c0_i32_1 = arith.constant 0 : i32
    return %c0_i32, %c0_i32_0 : i32, i32
  }
  func.func @transform_4(%arg0: i32) -> (i32, i32) {
    %c0_i32 = arith.constant 0 : i32
    %c0_i32_0 = arith.constant 0 : i32
    %c0_i32_1 = arith.constant 0 : i32
    return %c0_i32, %c0_i32_0 : i32, i32
  }
}

</mosaic_0001>

<bundles_post_ra>
// kernel: tpu_custom_call.1
= control target key start
LH: loop header
LB: loop body
LE: loop exit
PB: predicated region body
PF: predicated region fallthrough
CT: control target
= control target key end

     0   :  { %s623_s15 = smov 0   ;;  %s1127_s0 = inlined_call_operand.vmem [shape: f32[4,75,128], index: 0, kind: input, shape index: {}]   ;;  %s1128_s1 = inlined_call_operand.vmem [shape: f32[75,1], index: 1, kind: input, shape index: {}]   ;;  %s1129_s2 = inlined_call_operand.vmem [shape: f32[75,1], index: 2, kind: input, shape index: {}]   ;;  %s1130_s3 = inlined_call_operand.vmem [shape: f32[75,1], index: 3, kind: output, shape index: {0}]   ;;  %s1131_s4 = inlined_call_operand.vmem [shape: f32[75,1], index: 4, kind: output, shape index: {1}]  }
   0x1 LB: > { %s629_s16 = sadd.s32 4294967295, %s595_s15   ;;  %p553_p0 = scmp.ge.s32.totalorder %s595_s15, 1  ;;  %s595_s15 = sphi %s623_s15, %s15_s15  }
   0x2   : > { %p155_p1 = scmp.lt.s32.totalorder %s595_s15, 5 }
   0x4   : > { %p156_p2 = pnand %p553_p0, %p155_p1 }
   0x5   : > { %p176_p3 = scmp.lt.s32.totalorder (!%p156_p2), %s629_s16, 3  ;;  %p555_p4 = scmp.ne.s32.totalorder (!%p156_p2), %s629_s16, 0 }
   0x6   : > { %159 = sbr.rel (%p156_p2) target bundleno = 252 (0xfc), region = 32 }
   0xb   : > { %s177_s17 = scalar_select %p176_p3, %s629_s16, 3 }
   0xc   : > { %184 = sbr.rel (%p555_p4) target bundleno = 28 (0x1c), region = 36 }
   0xd   : > { %s559_s18 = smul.u32 80, %s177_s17 }
   0xf   : > { %s638_s21 = scalar_lea.vmem %s1127_s0, %s559_s18 }
  0x11   : > { %vm185_vm0 = vcmask 7168   ;;  %vm195_vm1 = vcmask 2048   ;;  %v597_v0 = vmov 0.0  }
  0x12   : > { %186 = vst.msk [vmem:[%s1130_s3] sm:$0xff] %vm185_vm0, %v597_v0  ;;  %187 = vst.msk [vmem:[%s1130_s3 + $0x8] sm:$0xff] %vm185_vm0, %v597_v0 }
  0x13   : > { %188 = vst.msk [vmem:[%s1130_s3 + $0x10] sm:$0xff] %vm185_vm0, %v597_v0  ;;  %189 = vst.msk [vmem:[%s1130_s3 + $0x18] sm:$0xff] %vm185_vm0, %v597_v0 }
  0x14   : > { %190 = vst.msk [vmem:[%s1130_s3 + $0x20] sm:$0xff] %vm185_vm0, %v597_v0  ;;  %191 = vst.msk [vmem:[%s1130_s3 + $0x28] sm:$0xff] %vm185_vm0, %v597_v0 }
  0x15   : > { %192 = vst.msk [vmem:[%s1130_s3 + $0x30] sm:$0xff] %vm185_vm0, %v597_v0  ;;  %193 = vst.msk [vmem:[%s1130_s3 + $0x38] sm:$0xff] %vm185_vm0, %v597_v0 }
  0x16   : > { %194 = vst.msk [vmem:[%s1130_s3 + $0x40] sm:$0xff] %vm185_vm0, %v597_v0  ;;  %197 = vst.msk [vmem:[%s1131_s4] sm:$0xff] %vm185_vm0, %v597_v0 }
  0x17   : > { %198 = vst.msk [vmem:[%s1131_s4 + $0x8] sm:$0xff] %vm185_vm0, %v597_v0  ;;  %199 = vst.msk [vmem:[%s1131_s4 + $0x10] sm:$0xff] %vm185_vm0, %v597_v0 }
  0x18   : > { %200 = vst.msk [vmem:[%s1131_s4 + $0x18] sm:$0xff] %vm185_vm0, %v597_v0  ;;  %201 = vst.msk [vmem:[%s1131_s4 + $0x20] sm:$0xff] %vm185_vm0, %v597_v0 }
  0x19   : > { %202 = vst.msk [vmem:[%s1131_s4 + $0x28] sm:$0xff] %vm185_vm0, %v597_v0  ;;  %203 = vst.msk [vmem:[%s1131_s4 + $0x30] sm:$0xff] %vm185_vm0, %v597_v0 }
  0x1a   : > { %204 = vst.msk [vmem:[%s1131_s4 + $0x38] sm:$0xff] %vm185_vm0, %v597_v0  ;;  %205 = vst.msk [vmem:[%s1131_s4 + $0x40] sm:$0xff] %vm185_vm0, %v597_v0 }
  0x1b   : > { %196 = vst.msk [vmem:[%s1130_s3 + $0x48] sm:$0x7] %vm195_vm1, %v597_v0  ;;  %206 = vst.msk [vmem:[%s1131_s4 + $0x48] sm:$0x7] %vm195_vm1, %v597_v0 }
  0x1c PF: > { %v209_v1 = vld [vmem:[%s638_s21 + $0x10] sm:$0xff]  ;;  %v207_v2 = vld [vmem:[%s638_s21] sm:$0xff]  ;;  %v210_v3 = vld [vmem:[%s638_s21 + $0x18] sm:$0xff]  ;;  %vm245_vm2 = vcmask 1042432   ;;  %vm269_vm3 = vcmask 7168   ;;  %vm279_vm4 = vcmask 2048  }
  0x1d   : > { %231 = vadd.xlane.f32.xlu1 %v209_v1  ;;  %227 = vadd.xlane.f32.xlu0 %v207_v2  ;;  %v208_v4 = vld [vmem:[%s638_s21 + $0x8] sm:$0xff]  ;;  %v211_v6 = vld [vmem:[%s638_s21 + $0x20] sm:$0xff]  ;;  %v214_v7 = vld [vmem:[%s638_s21 + $0x38] sm:$0xff]  ;;  %v291_v13 = vmul.f32 %v207_v2, %v207_v2  ;;  %v294_v14 = vmul.f32 %v210_v3, %v210_v3  ;;  %v293_v15 = vmul.f32 %v209_v1, %v209_v1  ;;  %p556_p5 = scmp.ne.s32.totalorder %s629_s16, 3 }
  0x1e   : > { %v212_v5 = vld [vmem:[%s638_s21 + $0x28] sm:$0xff]  ;;  %v213_v8 = vld [vmem:[%s638_s21 + $0x30] sm:$0xff]  ;;  %v215_v11 = vld [vmem:[%s638_s21 + $0x40] sm:$0xff]  ;;  %v292_v12 = vmul.f32 %v208_v4, %v208_v4  ;;  %v295_v17 = vmul.f32 %v211_v6, %v211_v6  ;;  %v298_v18 = vmul.f32 %v214_v7, %v214_v7 }
  0x1f   : > { %v216_v9 = vld [vmem:[%s638_s21 + $0x48] sm:$0x7]  ;;  %v296_v16 = vmul.f32 %v212_v5, %v212_v5  ;;  %v297_v19 = vmul.f32 %v213_v8, %v213_v8  ;;  %v299_v21 = vmul.f32 %v215_v11, %v215_v11  ;;  %v219_v23 = vld [vmem:[%s1130_s3 + $0x10] sm:$0xff]  ;;  %v217_v24 = vld [vmem:[%s1130_s3] sm:$0xff] }
  0x20   : > { %v246_v10 = vsel %vm245_vm2, %v216_v9, 0.0  ;;  %v300_v20 = vmul.f32 %v216_v9, %v216_v9  ;;  %v220_v29 = vld [vmem:[%s1130_s3 + $0x18] sm:$0xff]  ;;  %v218_v30 = vld [vmem:[%s1130_s3 + $0x8] sm:$0xff]  ;;  %v221_v36 = vld [vmem:[%s1130_s3 + $0x20] sm:$0xff] }
  0x21   : > { %233 = vadd.xlane.f32.xlu1 %v210_v3  ;;  %229 = vadd.xlane.f32.xlu0 %v208_v4  ;;  %v222_v35 = vld [vmem:[%s1130_s3 + $0x28] sm:$0xff]  ;;  %v224_v41 = vld [vmem:[%s1130_s3 + $0x38] sm:$0xff]  ;;  %v223_v42 = vld [vmem:[%s1130_s3 + $0x30] sm:$0xff] }
  0x22   : > { %v319_v22 = vsel %vm245_vm2, %v300_v20, 0.0  ;;  %v226_v47 = vld [vmem:[%s1130_s3 + $0x48] sm:$0x7]  ;;  %v225_v48 = vld [vmem:[%s1130_s3 + $0x40] sm:$0xff]  ;;  %v284_v59 = vld [vmem:[%s1131_s4 + $0x18] sm:$0xff] }
  0x23   : > { %v282_v53 = vld [vmem:[%s1131_s4 + $0x8] sm:$0xff]  ;;  %v281_v54 = vld [vmem:[%s1131_s4] sm:$0xff]  ;;  %v283_v60 = vld [vmem:[%s1131_s4 + $0x10] sm:$0xff] }
  0x24   : > { %v286_v1 = vld [vmem:[%s1131_s4 + $0x28] sm:$0xff]  ;;  %v285_v2 = vld [vmem:[%s1131_s4 + $0x20] sm:$0xff] }
  0x25   : > { %237 = vadd.xlane.f32.xlu1 %v212_v5  ;;  %235 = vadd.xlane.f32.xlu0 %v211_v6 }
  0x29   : > { %241 = vadd.xlane.f32.xlu1 %v214_v7  ;;  %239 = vadd.xlane.f32.xlu0 %v213_v8  ;;  %v288_v7 = vld [vmem:[%s1131_s4 + $0x38] sm:$0xff]  ;;  %v287_v8 = vld [vmem:[%s1131_s4 + $0x30] sm:$0xff] }
  0x2d   : > { %247 = vadd.xlane.f32.xlu1 %v246_v10  ;;  %243 = vadd.xlane.f32.xlu0 %v215_v11 }
  0x31   : > { %303 = vadd.xlane.f32.xlu1 %v292_v12  ;;  %301 = vadd.xlane.f32.xlu0 %v291_v13  ;;  %v290_v13 = vld [vmem:[%s1131_s4 + $0x48] sm:$0x7] }
  0x35   : > { %307 = vadd.xlane.f32.xlu1 %v294_v14  ;;  %305 = vadd.xlane.f32.xlu0 %v293_v15  ;;  %v289_v14 = vld [vmem:[%s1131_s4 + $0x40] sm:$0xff] }
  0x39   : > { %311 = vadd.xlane.f32.xlu1 %v296_v16  ;;  %309 = vadd.xlane.f32.xlu0 %v295_v17 }
  0x3d   : > { %315 = vadd.xlane.f32.xlu1 %v298_v18  ;;  %313 = vadd.xlane.f32.xlu0 %v297_v19 }
  0x41   : > { %320 = vadd.xlane.f32.xlu1 %v319_v22  ;;  %317 = vadd.xlane.f32.xlu0 %v299_v21 }
  0xa6   : > { %v232_v25 = vpop.xlane.xlu1 %231  ;;  %v228_v26 = vpop.xlane.xlu0 %227 }
  0xa7   : > { %v261_v27 = vadd.f32 %v232_v25, %v219_v23  ;;  %v259_v28 = vadd.f32 %v228_v26, %v217_v24 }
  0xa9   : > { %272 = vst.msk [vmem:[%s1130_s3 + $0x10] sm:$0xff] %vm269_vm3, %v261_v27  ;;  %270 = vst.msk [vmem:[%s1130_s3] sm:$0xff] %vm269_vm3, %v259_v28 }
  0xaa   : > { %v234_v31 = vpop.xlane.xlu1 %233  ;;  %v230_v32 = vpop.xlane.xlu0 %229 }
  0xab   : > { %v262_v33 = vadd.f32 %v234_v31, %v220_v29  ;;  %v260_v34 = vadd.f32 %v230_v32, %v218_v30 }
  0xad   : > { %273 = vst.msk [vmem:[%s1130_s3 + $0x18] sm:$0xff] %vm269_vm3, %v262_v33  ;;  %271 = vst.msk [vmem:[%s1130_s3 + $0x8] sm:$0xff] %vm269_vm3, %v260_v34 }
  0xae   : > { %v238_v37 = vpop.xlane.xlu1 %237  ;;  %v236_v38 = vpop.xlane.xlu0 %235 }
  0xaf   : > { %v264_v39 = vadd.f32 %v238_v37, %v222_v35  ;;  %v263_v40 = vadd.f32 %v236_v38, %v221_v36 }
  0xb1   : > { %275 = vst.msk [vmem:[%s1130_s3 + $0x28] sm:$0xff] %vm269_vm3, %v264_v39  ;;  %274 = vst.msk [vmem:[%s1130_s3 + $0x20] sm:$0xff] %vm269_vm3, %v263_v40 }
  0xb2   : > { %v242_v43 = vpop.xlane.xlu1 %241  ;;  %v240_v44 = vpop.xlane.xlu0 %239 }
  0xb3   : > { %v266_v45 = vadd.f32 %v242_v43, %v224_v41  ;;  %v265_v46 = vadd.f32 %v240_v44, %v223_v42 }
  0xb5   : > { %277 = vst.msk [vmem:[%s1130_s3 + $0x38] sm:$0xff] %vm269_vm3, %v266_v45  ;;  %276 = vst.msk [vmem:[%s1130_s3 + $0x30] sm:$0xff] %vm269_vm3, %v265_v46 }
  0xb6   : > { %v248_v49 = vpop.xlane.xlu1 %247  ;;  %v244_v50 = vpop.xlane.xlu0 %243 }
  0xb7   : > { %v268_v51 = vadd.f32 %v248_v49, %v226_v47  ;;  %v267_v52 = vadd.f32 %v244_v50, %v225_v48 }
  0xb9   : > { %280 = vst.msk [vmem:[%s1130_s3 + $0x48] sm:$0x7] %vm279_vm4, %v268_v51 }
  0xba   : > { %278 = vst.msk [vmem:[%s1130_s3 + $0x40] sm:$0xff] %vm269_vm3, %v267_v52  ;;  %v304_v55 = vpop.xlane.xlu1 %303  ;;  %v302_v56 = vpop.xlane.xlu0 %301 }
  0xbb   : > { %v333_v57 = vadd.f32 %v304_v55, %v282_v53  ;;  %v332_v58 = vadd.f32 %v302_v56, %v281_v54 }
  0xbd   : > { %343 = vst.msk [vmem:[%s1131_s4 + $0x8] sm:$0xff] %vm269_vm3, %v333_v57  ;;  %342 = vst.msk [vmem:[%s1131_s4] sm:$0xff] %vm269_vm3, %v332_v58 }
  0xbe   : > { %v308_v61 = vpop.xlane.xlu1 %307  ;;  %v306_v62 = vpop.xlane.xlu0 %305 }
  0xbf   : > { %v335_v63 = vadd.f32 %v308_v61, %v284_v59  ;;  %v334_v0 = vadd.f32 %v306_v62, %v283_v60 }
  0xc1   : > { %345 = vst.msk [vmem:[%s1131_s4 + $0x18] sm:$0xff] %vm269_vm3, %v335_v63  ;;  %344 = vst.msk [vmem:[%s1131_s4 + $0x10] sm:$0xff] %vm269_vm3, %v334_v0 }
  0xc2   : > { %v312_v3 = vpop.xlane.xlu1 %311  ;;  %v310_v4 = vpop.xlane.xlu0 %309 }
  0xc3   : > { %v337_v5 = vadd.f32 %v312_v3, %v286_v1  ;;  %v336_v6 = vadd.f32 %v310_v4, %v285_v2 }
  0xc5   : > { %347 = vst.msk [vmem:[%s1131_s4 + $0x28] sm:$0xff] %vm269_vm3, %v337_v5  ;;  %346 = vst.msk [vmem:[%s1131_s4 + $0x20] sm:$0xff] %vm269_vm3, %v336_v6 }
  0xc6   : > { %v316_v9 = vpop.xlane.xlu1 %315  ;;  %v314_v10 = vpop.xlane.xlu0 %313 }
  0xc7   : > { %v339_v11 = vadd.f32 %v316_v9, %v288_v7  ;;  %v338_v12 = vadd.f32 %v314_v10, %v287_v8 }
  0xc9   : > { %349 = vst.msk [vmem:[%s1131_s4 + $0x38] sm:$0xff] %vm269_vm3, %v339_v11  ;;  %348 = vst.msk [vmem:[%s1131_s4 + $0x30] sm:$0xff] %vm269_vm3, %v338_v12 }
  0xca   : > { %v321_v15 = vpop.xlane.xlu1 %320  ;;  %v318_v16 = vpop.xlane.xlu0 %317  ;;  %355 = sbr.rel (%p556_p5) target bundleno = 252 (0xfc), region = 40 }
  0xcb   : > { %v341_v17 = vadd.f32 %v321_v15, %v290_v13  ;;  %v340_v18 = vadd.f32 %v318_v16, %v289_v14 }
  0xcd   : > { %351 = vst.msk [vmem:[%s1131_s4 + $0x48] sm:$0x7] %vm279_vm4, %v341_v17 }
  0xce   : > { %350 = vst.msk [vmem:[%s1131_s4 + $0x40] sm:$0xff] %vm269_vm3, %v340_v18 }
  0xcf   : > { %v356_v19 = vld [vmem:[%s1130_s3] sm:$0xff]  ;;  %v357_v23 = vld [vmem:[%s1130_s3 + $0x8] sm:$0xff]  ;;  %v358_v27 = vld [vmem:[%s1130_s3 + $0x10] sm:$0xff] }
  0xd0   : > { %v366_v20 = vld [vmem:[%s1131_s4] sm:$0xff]  ;;  %v880_v21 = vmul.f32 0.001953125, %v356_v19  ;;  %v367_v24 = vld [vmem:[%s1131_s4 + $0x8] sm:$0xff]  ;;  %v888_v25 = vmul.f32 0.001953125, %v357_v23  ;;  %v368_v28 = vld [vmem:[%s1131_s4 + $0x10] sm:$0xff]  ;;  %v898_v30 = vmul.f32 0.001953125, %v358_v27 }
  0xd1   : > { %v386_v22 = vmul.f32 0.001953125, %v366_v20  ;;  %v387_v26 = vmul.f32 0.001953125, %v367_v24  ;;  %v388_v31 = vmul.f32 0.001953125, %v368_v28  ;;  %v359_v32 = vld [vmem:[%s1130_s3 + $0x18] sm:$0xff]  ;;  %v360_v37 = vld [vmem:[%s1130_s3 + $0x20] sm:$0xff]  ;;  %v361_v43 = vld [vmem:[%s1130_s3 + $0x28] sm:$0xff] }
  0xd2   : > { %v396_v29 = vmul.f32 %v880_v21, %v880_v21  ;;  %v369_v33 = vld [vmem:[%s1131_s4 + $0x18] sm:$0xff]  ;;  %v397_v34 = vmul.f32 %v888_v25, %v888_v25  ;;  %v908_v35 = vmul.f32 0.001953125, %v359_v32  ;;  %v370_v38 = vld [vmem:[%s1131_s4 + $0x20] sm:$0xff]  ;;  %v398_v40 = vmul.f32 %v898_v30, %v898_v30  ;;  %v371_v44 = vld [vmem:[%s1131_s4 + $0x28] sm:$0xff] }
  0xd3   : > { %v389_v36 = vmul.f32 0.001953125, %v369_v33  ;;  %v918_v41 = vmul.f32 0.001953125, %v360_v37  ;;  %v390_v42 = vmul.f32 0.001953125, %v370_v38  ;;  %v928_v47 = vmul.f32 0.001953125, %v361_v43  ;;  %v362_v49 = vld [vmem:[%s1130_s3 + $0x30] sm:$0xff]  ;;  %v363_v55 = vld [vmem:[%s1130_s3 + $0x38] sm:$0xff] }
  0xd4   : > { %v406_v39 = vsub.f32 %v386_v22, %v396_v29  ;;  %v407_v45 = vsub.f32 %v387_v26, %v397_v34  ;;  %v399_v46 = vmul.f32 %v908_v35, %v908_v35  ;;  %v391_v48 = vmul.f32 0.001953125, %v371_v44  ;;  %v372_v50 = vld [vmem:[%s1131_s4 + $0x30] sm:$0xff]  ;;  %v373_v0 = vld [vmem:[%s1131_s4 + $0x38] sm:$0xff]  ;;  %v364_v8 = vld [vmem:[%s1130_s3 + $0x40] sm:$0xff] }
  0xd5   : > { %v408_v52 = vsub.f32 %v388_v31, %v398_v40  ;;  %v400_v53 = vmul.f32 %v918_v41, %v918_v41  ;;  %v938_v54 = vmul.f32 0.001953125, %v362_v49  ;;  %v401_v58 = vmul.f32 %v928_v47, %v928_v47  ;;  %v374_v9 = vld [vmem:[%s1131_s4 + $0x40] sm:$0xff]  ;;  %v365_v13 = vld [vmem:[%s1130_s3 + $0x48] sm:$0x7]  ;;  %v428_v43 = vld [vmem:[%s1128_s1 + $0x10] sm:$0xff] }
  0xd6   : > { %v416_v51 = vmax.f32 %v406_v39, 0.0  ;;  %v417_v56 = vmax.f32 %v407_v45, 0.0  ;;  %v409_v57 = vsub.f32 %v389_v36, %v399_v46  ;;  %v392_v59 = vmul.f32 0.001953125, %v372_v50  ;;  %v375_v17 = vld [vmem:[%s1131_s4 + $0x48] sm:$0x7]  ;;  %v426_v37 = vld [vmem:[%s1128_s1] sm:$0xff] }
  0xd7   : > { %v418_v61 = vmax.f32 %v408_v52, 0.0  ;;  %v410_v62 = vsub.f32 %v390_v42, %v400_v53  ;;  %v402_v63 = vmul.f32 %v938_v54, %v938_v54  ;;  %v411_v3 = vsub.f32 %v391_v48, %v401_v58  ;;  %v427_v39 = vld [vmem:[%s1128_s1 + $0x8] sm:$0xff]  ;;  %v429_v46 = vld [vmem:[%s1128_s1 + $0x18] sm:$0xff]  ;;  %v430_v50 = vld [vmem:[%s1128_s1 + $0x20] sm:$0xff] }
  0xd8   : > { %v436_v60 = vadd.f32 1e-05, %v416_v51  ;;  %v437_v1 = vadd.f32 1e-05, %v417_v56  ;;  %v419_v2 = vmax.f32 %v409_v57, 0.0  ;;  %v950_v4 = vmul.f32 0.001953125, %v363_v55 }
  0xd9   : > { %v438_v5 = vadd.f32 1e-05, %v418_v61  ;;  %v420_v6 = vmax.f32 %v410_v62, 0.0  ;;  %v412_v7 = vsub.f32 %v392_v59, %v402_v63  ;;  %v421_v11 = vmax.f32 %v411_v3, 0.0  ;;  %v476_v51 = vld [vmem:[%s1129_s2] sm:$0xff]  ;;  %v431_v55 = vld [vmem:[%s1128_s1 + $0x28] sm:$0xff] }
  0xda   : > { %569 = vrsqrt.f32 %v436_v60  ;;  %v439_v10 = vadd.f32 1e-05, %v419_v2  ;;  %v393_v12 = vmul.f32 0.001953125, %v373_v0  ;;  %v403_v16 = vmul.f32 %v950_v4, %v950_v4  ;;  %v477_v57 = vld [vmem:[%s1129_s2 + $0x8] sm:$0xff]  ;;  %v432_v60 = vld [vmem:[%s1128_s1 + $0x30] sm:$0xff]  ;;  %v479_v2 = vld [vmem:[%s1129_s2 + $0x18] sm:$0xff] }
  0xdb   : > { %571 = vrsqrt.f32 %v437_v1  ;;  %v440_v14 = vadd.f32 1e-05, %v420_v6  ;;  %v422_v15 = vmax.f32 %v412_v7, 0.0  ;;  %v441_v18 = vadd.f32 1e-05, %v421_v11  ;;  %v480_v7 = vld [vmem:[%s1129_s2 + $0x20] sm:$0xff] }
  0xdc   : > { %573 = vrsqrt.f32 %v438_v5  ;;  %v966_v19 = vmul.f32 0.001953125, %v364_v8  ;;  %v394_v20 = vmul.f32 0.001953125, %v374_v9  ;;  %v413_v23 = vsub.f32 %v393_v12, %v403_v16  ;;  %v482_v12 = vld [vmem:[%s1129_s2 + $0x30] sm:$0xff] }
  0xdd   : > { %575 = vrsqrt.f32 %v439_v10  ;;  %v442_v22 = vadd.f32 1e-05, %v422_v15  ;;  %v968_v24 = vmul.f32 0.001953125, %v365_v13  ;;  %v395_v27 = vmul.f32 0.001953125, %v375_v17  ;;  %v433_v10 = vld [vmem:[%s1128_s1 + $0x38] sm:$0xff]  ;;  %v434_v17 = vld [vmem:[%s1128_s1 + $0x40] sm:$0xff] }
  0xde   : > { %577 = vrsqrt.f32 %v440_v14  ;;  %v404_v26 = vmul.f32 %v966_v19, %v966_v19  ;;  %v423_v28 = vmax.f32 %v413_v23, 0.0 }
  0xdf   : > { %579 = vrsqrt.f32 %v441_v18  ;;  %v405_v29 = vmul.f32 %v968_v24, %v968_v24 }
  0xe0   : > { %581 = vrsqrt.f32 %v442_v22  ;;  %v414_v31 = vsub.f32 %v394_v20, %v404_v26  ;;  %v443_v32 = vadd.f32 1e-05, %v423_v28  ;;  %v483_v20 = vld [vmem:[%s1129_s2 + $0x38] sm:$0xff] }
  0xe1   : > { %v415_v33 = vsub.f32 %v395_v27, %v405_v29 }
  0xe2   : > { %v424_v34 = vmax.f32 %v414_v31, 0.0  ;;  %583 = vrsqrt.f32 %v443_v32  ;;  %v484_v31 = vld [vmem:[%s1129_s2 + $0x40] sm:$0xff] }
  0xe3   : > { %v425_v36 = vmax.f32 %v415_v33, 0.0  ;;  %v485_v33 = vld [vmem:[%s1129_s2 + $0x48] sm:$0x7] }
  0xe4   : > { %v444_v38 = vadd.f32 1e-05, %v424_v34 }
  0xe5   : > { %v445_v40 = vadd.f32 1e-05, %v425_v36 }
  0xe6   : > { %585 = vrsqrt.f32 %v444_v38 }
  0xe7   : > { %v570_v42 = vpop.eup %569  ;;  %587 = vrsqrt.f32 %v445_v40 }
  0xe8   : > { %v572_v44 = vpop.eup %571  ;;  %v456_v45 = vmul.f32 %v570_v42, %v426_v37 }
  0xe9   : > { %v574_v48 = vpop.eup %573  ;;  %v457_v49 = vmul.f32 %v572_v44, %v427_v39 }
  0xea   : > { %v576_v52 = vpop.eup %575  ;;  %466 = vst.msk [vmem:[%s1130_s3] sm:$0xff] %vm269_vm3, %v456_v45  ;;  %v458_v53 = vmul.f32 %v574_v48, %v428_v43  ;;  %v486_v56 = vmul.f32 %v456_v45, %v880_v21  ;;  %v478_v21 = vld [vmem:[%s1129_s2 + $0x10] sm:$0xff] }
  0xeb   : > { %v578_v58 = vpop.eup %577  ;;  %467 = vst.msk [vmem:[%s1130_s3 + $0x8] sm:$0xff] %vm269_vm3, %v457_v49  ;;  %v459_v59 = vmul.f32 %v576_v52, %v429_v46  ;;  %v487_v61 = vmul.f32 %v457_v49, %v888_v25 }
  0xec   : > { %v580_v62 = vpop.eup %579  ;;  %468 = vst.msk [vmem:[%s1130_s3 + $0x10] sm:$0xff] %vm269_vm3, %v458_v53  ;;  %v460_v63 = vmul.f32 %v578_v58, %v430_v50  ;;  %v496_v0 = vsub.f32 %v476_v51, %v486_v56  ;;  %v488_v1 = vmul.f32 %v458_v53, %v898_v30 }
  0xed   : > { %v582_v3 = vpop.eup %581  ;;  %469 = vst.msk [vmem:[%s1130_s3 + $0x18] sm:$0xff] %vm269_vm3, %v459_v59  ;;  %v461_v25 = vmul.f32 %v580_v62, %v431_v55  ;;  %v497_v5 = vsub.f32 %v477_v57, %v487_v61  ;;  %v489_v6 = vmul.f32 %v459_v59, %v908_v35  ;;  %v481_v35 = vld [vmem:[%s1129_s2 + $0x28] sm:$0xff] }
  0xee   : > { %470 = vst.msk [vmem:[%s1130_s3 + $0x20] sm:$0xff] %vm269_vm3, %v460_v63  ;;  %v462_v30 = vmul.f32 %v582_v3, %v432_v60  ;;  %506 = vst.msk [vmem:[%s1131_s4] sm:$0xff] %vm269_vm3, %v496_v0  ;;  %v498_v8 = vsub.f32 %v478_v21, %v488_v1  ;;  %v490_v9 = vmul.f32 %v460_v63, %v918_v41 }
  0xef   : > { %471 = vst.msk [vmem:[%s1130_s3 + $0x28] sm:$0xff] %vm269_vm3, %v461_v25  ;;  %507 = vst.msk [vmem:[%s1131_s4 + $0x8] sm:$0xff] %vm269_vm3, %v497_v5  ;;  %v499_v11 = vsub.f32 %v479_v2, %v489_v6  ;;  %v491_v41 = vmul.f32 %v461_v25, %v928_v47  ;;  %v584_v15 = vpop.eup %583 }
  0xf0   : > { %472 = vst.msk [vmem:[%s1130_s3 + $0x30] sm:$0xff] %vm269_vm3, %v462_v30  ;;  %508 = vst.msk [vmem:[%s1131_s4 + $0x10] sm:$0xff] %vm269_vm3, %v498_v8  ;;  %v500_v13 = vsub.f32 %v480_v7, %v490_v9  ;;  %v492_v14 = vmul.f32 %v462_v30, %v938_v54  ;;  %v463_v16 = vmul.f32 %v584_v15, %v433_v10  ;;  %v435_v54 = vld [vmem:[%s1128_s1 + $0x48] sm:$0x7] }
  0xf1   : > { %509 = vst.msk [vmem:[%s1131_s4 + $0x18] sm:$0xff] %vm269_vm3, %v499_v11  ;;  %v501_v47 = vsub.f32 %v481_v35, %v491_v41 }
  0xf2   : > { %510 = vst.msk [vmem:[%s1131_s4 + $0x20] sm:$0xff] %vm269_vm3, %v500_v13  ;;  %v502_v18 = vsub.f32 %v482_v12, %v492_v14  ;;  %473 = vst.msk [vmem:[%s1130_s3 + $0x38] sm:$0xff] %vm269_vm3, %v463_v16  ;;  %v493_v23 = vmul.f32 %v463_v16, %v950_v4 }
  0xf3   : > { %511 = vst.msk [vmem:[%s1131_s4 + $0x28] sm:$0xff] %vm269_vm3, %v501_v47  ;;  %v586_v22 = vpop.eup %585 }
  0xf4   : > { %512 = vst.msk [vmem:[%s1131_s4 + $0x30] sm:$0xff] %vm269_vm3, %v502_v18  ;;  %v588_v26 = vpop.eup %587  ;;  %v464_v27 = vmul.f32 %v586_v22, %v434_v17  ;;  %v503_v29 = vsub.f32 %v483_v20, %v493_v23 }
  0xf5   : > { %v465_v28 = vmul.f32 %v588_v26, %v435_v54 }
  0xf6   : > { %474 = vst.msk [vmem:[%s1130_s3 + $0x40] sm:$0xff] %vm269_vm3, %v464_v27  ;;  %v494_v32 = vmul.f32 %v464_v27, %v966_v19  ;;  %513 = vst.msk [vmem:[%s1131_s4 + $0x38] sm:$0xff] %vm269_vm3, %v503_v29 }
  0xf7   : > { %475 = vst.msk [vmem:[%s1130_s3 + $0x48] sm:$0x7] %vm279_vm4, %v465_v28  ;;  %v495_v4 = vmul.f32 %v465_v28, %v968_v24 }
  0xf8   : > { %v504_v34 = vsub.f32 %v484_v31, %v494_v32 }
  0xf9   : > { %v505_v36 = vsub.f32 %v485_v33, %v495_v4 }
  0xfa   : > { %514 = vst.msk [vmem:[%s1131_s4 + $0x40] sm:$0xff] %vm269_vm3, %v504_v34 }
  0xfb   : > { %515 = vst.msk [vmem:[%s1131_s4 + $0x48] sm:$0x7] %vm279_vm4, %v505_v36 }
  0xfc PF: > { %s15_s15 = sadd.s32 1, %s595_s15  }
  0xfd   : > { %p12_p6 = scmp.ge.s32.totalorder %s15_s15, 6  }
  0xff   :  { %14 = sbr.rel (!%p12_p6) target bundleno = 1 (0x1), region = 74 }

</bundles_post_ra>
